<compile_context>
chip_gen: v7x
topology: tpu7x:2x2x1
jax: 0.10.0
libtpu: 0.0.40
codegen_flags: <defaults>
</compile_context>

<pallas_src>
import jax
import jax.numpy as jnp
from jax.experimental import pallas as pl
from jax.experimental.pallas import tpu as pltpu


def _round_up(n, m):
    return ((n + m - 1) // m) * m


def _gaussian_kernel(xe_ref, c_ref, o_ref):
    # xe_ref: (tm, 1) f32 fused (mul*x + bias) stream.
    # c_ref:  (8, K) f32 stacked constants: row0=mean, row1=a, row2=log_coef.
    # o_ref:  (tm, K) output in the module's parameter dtype.
    xe = xe_ref[...]                       # (tm, 1)
    mean = c_ref[0:1, :]                   # (1, K)
    a = c_ref[1:2, :]                      # (1, K)  = 1/(std*sqrt(2))
    log_coef = c_ref[2:3, :]               # (1, K)  = log(1/(std*sqrt(2*pi)))
    t = (xe - mean) * a                    # broadcast -> (tm, K)
    o_ref[...] = jnp.exp(log_coef - t * t).astype(o_ref.dtype)


def gaussian_layer_pallas(x, edge_type, means_w, stds_w, mul_w, bias_w, *, tm=4096):
    """x: (B, N, N) float, edge_type: (B, N, N) int32.

    means_w/stds_w: (1, K); mul_w/bias_w: (edge_types, 1).
    Returns (B, N, N, K) in means_w.dtype (matches the PyTorch module).
    """
    B, N1, N2 = x.shape
    K = means_w.shape[-1]
    M = B * N1 * N2
    out_dtype = means_w.dtype

    # --- cheap glue in plain JAX: embedding gather + affine, one (M, 1) stream.
    e_flat = edge_type.reshape(-1)
    mul = mul_w[e_flat, 0].astype(x.dtype)
    bias = bias_w[e_flat, 0].astype(x.dtype)
    xe = (mul * x.reshape(-1) + bias).astype(jnp.float32).reshape(M, 1)

    # --- fold per-basis constants so the kernel is sub/mul/mul/sub + exp.
    pi = 3.14159  # matches the torch.jit.script gaussian()
    mean = means_w.astype(jnp.float32).reshape(K)
    std = jnp.abs(stds_w.astype(jnp.float32).reshape(K)) + 1e-5
    inv_std = 1.0 / std
    a = inv_std * (1.0 / jnp.sqrt(2.0))                 # so t*t == 0.5*z^2
    log_coef = jnp.log(inv_std * (1.0 / jnp.sqrt(2.0 * pi)))
    consts = jnp.zeros((8, K), jnp.float32)
    consts = consts.at[0].set(mean).at[1].set(a).at[2].set(log_coef)

    # --- tiling: big row tiles, tm forced to a multiple of 8, ragged last
    # block handled by Pallas masked stores (no padding, no post-slice).
    tm = max(8, min(int(tm), _round_up(M, 8)))
    tm = _round_up(tm, 8)
    grid = (pl.cdiv(M, tm),)

    itemsize = jnp.dtype(out_dtype).itemsize
    cost = pl.CostEstimate(
        flops=5 * M * K,
        transcendentals=M * K,
        bytes_accessed=M * K * itemsize + M * 4 + 8 * K * 4,
    )

    out = pl.pallas_call(
        _gaussian_kernel,
        out_shape=jax.ShapeDtypeStruct((M, K), out_dtype),
        grid_spec=pl.GridSpec(
            grid=grid,
            in_specs=[
                pl.BlockSpec((tm, 1), lambda i: (i, 0)),   # xe (fused mul*x+bias)
                pl.BlockSpec((8, K), lambda i: (0, 0)),    # stacked constants
            ],
            out_specs=pl.BlockSpec((tm, K), lambda i: (i, 0)),
        ),
        compiler_params=pltpu.CompilerParams(
            dimension_semantics=("parallel",)),
        cost_estimate=cost,
    )(xe, consts)

    return out.reshape(B, N1, N2, K)


def gaussian_layer_ref(x, edge_type, means_w, stds_w, mul_w, bias_w):
    """Pure-JAX reference mirroring the PyTorch forward."""
    K = means_w.shape[-1]
    mul = mul_w[edge_type].astype(x.dtype)          # (B,N,N,1)
    bias = bias_w[edge_type].astype(x.dtype)        # (B,N,N,1)
    xe = mul * x[..., None] + bias                  # (B,N,N,1)
    xe = jnp.broadcast_to(xe, xe.shape[:-1] + (K,)).astype(jnp.float32)
    mean = means_w.astype(jnp.float32).reshape(-1)
    std = jnp.abs(stds_w.astype(jnp.float32).reshape(-1)) + 1e-5
    pi = 3.14159
    a = (2.0 * pi) ** 0.5
    out = jnp.exp(-0.5 * ((xe - mean) / std) ** 2) / (a * std)
    return out.astype(means_w.dtype)


if __name__ == "__main__":
    K = 128
    edge_types = 1024
    B, N = 2, 9   # M = 162 -> exercises ragged (masked) blocks

    key = jax.random.PRNGKey(0)
    k_means, k_stds, k_x, k_e = jax.random.split(key, 4)

    # Deterministic parameter init matching nn.init in __init__.
    means_w = jax.random.uniform(k_means, (1, K), jnp.float32, 0.0, 3.0)
    stds_w = jax.random.uniform(k_stds, (1, K), jnp.float32, 0.0, 3.0)
    mul_w = jnp.ones((edge_types, 1), jnp.float32)     # constant 1
    bias_w = jnp.zeros((edge_types, 1), jnp.float32)   # constant 0

    # Example inputs: pairwise-distance-like tensor and edge types.
    x = jax.random.uniform(k_x, (B, N, N), jnp.float32, 0.0, 5.0)
    edge_type = jax.random.randint(k_e, (B, N, N), 0, edge_types, jnp.int32)

    # Small tile in the test: multi-step grid with a ragged (masked) last block.
    out = gaussian_layer_pallas(x, edge_type, means_w, stds_w, mul_w, bias_w, tm=64)
    out = jax.block_until_ready(out)

    # Default (large-tile, single ragged block) path too.
    out2 = gaussian_layer_pallas(x, edge_type, means_w, stds_w, mul_w, bias_w)
    out2 = jax.block_until_ready(out2)

    ref = gaussian_layer_ref(x, edge_type, means_w, stds_w, mul_w, bias_w)
    assert out.shape == (B, N, N, K), out.shape
    assert out2.shape == (B, N, N, K), out2.shape
    assert jnp.allclose(out, ref, atol=1e-5, rtol=1e-5), "mismatch vs reference"
    assert jnp.allclose(out2, ref, atol=1e-5, rtol=1e-5), "mismatch vs reference"

    print("KERNEL_OK")
</pallas_src>

<mosaic_0001>
module attributes {stable_mosaic.version = 11 : i64} {
  func.func @_gaussian_kernel(%arg0: i32, %arg1: memref<64x1xf32, #tpu.memory_space<vmem>>, %arg2: memref<8x128xf32, #tpu.memory_space<vmem>>, %arg3: memref<64x128xf32, #tpu.memory_space<vmem>>) attributes {dimension_semantics = [#tpu.dimension_semantics<parallel>], iteration_bounds = array<i64: 3>, scalar_prefetch = 0 : i64, scratch_operands = 0 : i64, tpu.core_type = #tpu.core_type<tc>, window_params = [{transform_indices = @transform_0, window_bounds = array<i64: 64, 1>}, {pipeline_mode = #tpu.pipeline_mode<synchronous>, transform_indices = @transform_1, window_bounds = array<i64: 8, 128>}, {transform_indices = @transform_2, window_bounds = array<i64: 64, 128>}]} {
    %c0 = arith.constant 0 : index
    %c0_0 = arith.constant 0 : index
    %0 = vector.load %arg1[%c0, %c0_0] : memref<64x1xf32, #tpu.memory_space<vmem>>, vector<64x1xf32>
    %c0_1 = arith.constant 0 : index
    %c0_2 = arith.constant 0 : index
    %1 = vector.load %arg2[%c0_1, %c0_2] : memref<8x128xf32, #tpu.memory_space<vmem>>, vector<1x128xf32>
    %c1 = arith.constant 1 : index
    %c0_3 = arith.constant 0 : index
    %2 = vector.load %arg2[%c1, %c0_3] : memref<8x128xf32, #tpu.memory_space<vmem>>, vector<1x128xf32>
    %c2 = arith.constant 2 : index
    %c0_4 = arith.constant 0 : index
    %3 = vector.load %arg2[%c2, %c0_4] : memref<8x128xf32, #tpu.memory_space<vmem>>, vector<1x128xf32>
    %4 = vector.broadcast %0 : vector<64x1xf32> to vector<64x128xf32>
    %5 = vector.broadcast %1 : vector<1x128xf32> to vector<64x128xf32>
    %6 = arith.subf %4, %5 : vector<64x128xf32>
    %7 = vector.broadcast %2 : vector<1x128xf32> to vector<64x128xf32>
    %8 = arith.mulf %6, %7 : vector<64x128xf32>
    %9 = arith.mulf %8, %8 : vector<64x128xf32>
    %10 = vector.broadcast %3 : vector<1x128xf32> to vector<64x128xf32>
    %11 = arith.subf %10, %9 : vector<64x128xf32>
    %12 = math.exp %11 : vector<64x128xf32>
    %c0_5 = arith.constant 0 : index
    %c0_6 = arith.constant 0 : index
    %13 = vector.load %arg3[%c0_5, %c0_6] : memref<64x128xf32, #tpu.memory_space<vmem>>, vector<64x128xf32>
    tpu.vector_store %arg3[%c0_5, %c0_6], %12 {strides = array<i32>} : memref<64x128xf32, #tpu.memory_space<vmem>>, vector<64x128xf32>,
    return
  }
  func.func @transform_0(%arg0: i32) -> (i32, i32) {
    %c0_i32 = arith.constant 0 : i32
    %c0_i32_0 = arith.constant 0 : i32
    return %arg0, %c0_i32 : i32, i32
  }
  func.func @transform_1(%arg0: i32) -> (i32, i32) {
    %c0_i32 = arith.constant 0 : i32
    %c0_i32_0 = arith.constant 0 : i32
    %c0_i32_1 = arith.constant 0 : i32
    return %c0_i32, %c0_i32_0 : i32, i32
  }
  func.func @transform_2(%arg0: i32) -> (i32, i32) {
    %c0_i32 = arith.constant 0 : i32
    %c0_i32_0 = arith.constant 0 : i32
    return %arg0, %c0_i32 : i32, i32
  }
}

</mosaic_0001>

<bundles_post_ra>
// kernel: tpu_custom_call.1
= control target key start
LH: loop header
LB: loop body
LE: loop exit
PB: predicated region body
PF: predicated region fallthrough
CT: control target
= control target key end

     0   :  { %7 = vsyncpa [#allocation3], 0  ;;  %s673_s0 = inlined_call_operand.vmem [shape: f32[162,1], index: 0, kind: input, shape index: {}]   ;;  %s674_s1 = inlined_call_operand.vmem [shape: f32[8,128], index: 1, kind: input, shape index: {}]   ;;  %s675_s2 = inlined_call_operand.hbm [shape: f32[162,128], index: 2, kind: output, shape index: {}]  }
   0x1   :  { %9 = vsyncpa [#allocation3 + $0x1], 0  ;;  %s532_s9 = smov 0   ;;  %s534_s10 = smov 0  }
   0x2   :  { %s536_s11 = smov 0   ;;  %s538_s12 = smov 0  }
   0x3 LB: > { %s553_s13 = sadd.s32 4294967295, %s511_s12   ;;  %s370_s14 = sadd.s32 4294967294, %s511_s12   ;;  %s511_s12 = sphi %s538_s12, %s681_s12   ;;  %s507_s11 = sphi %s536_s11, %s680_s11   ;;  %s503_s10 = sphi %s534_s10, %s679_s10   ;;  %s499_s9 = sphi %s532_s9, %s678_s9  }
   0x4   : > { %s557_s15 = sadd.s32 1, %s511_s12   ;;  %s69_s16 = sadd.s32 1, %s507_s11 }
   0x5   : > { %s66_s17 = ssub.s32 %s511_s12, %s557_s15  ;;  %p79_p0 = scmp.ne.s32.totalorder %s507_s11, %s503_s10 }
   0x6   : > { %p67_p1 = scmp.eq.s32.totalorder %s66_s17, 0  ;;  %p80_p2 = scmp.eq.s32.totalorder %s553_s13, 2 }
   0x7   : > { %p85_p3 = scmp.ne.s32.totalorder %s503_s10, %s499_s9  ;;  %p86_p4 = scmp.eq.s32.totalorder %s370_s14, 2 }
   0x8   : > { %s568_s18 = scalar_select %p67_p1, %s507_s11, %s69_s16  }
   0x9   : > { %p570_p5 = por %p80_p2, %p79_p0  ;;  %p574_p6 = por %p86_p4, %p85_p3 }
   0xa   : > { %p373_p7 = scmp.ge.s32.totalorder %s511_s12, 1  ;;  %p124_p8 = scmp.lt.s32.totalorder %s511_s12, 4 }
   0xc   : > { %p125_p9 = pnand %p373_p7, %p124_p8 }
   0xd   : > { %s581_s21 = sshll.u32 (!%p125_p9), %s553_s13, 3  ;;  %v513_v0 = vmov (!%p125_p9), 0   ;;  %s147_s27 = sand.u32 (!%p125_p9), 1, %s503_s10   ;;  %v377_v9 = vld [vmem:[%s674_s1] ss:$0 sm:$0xff] (!%p125_p9) }
   0xe   : > { %128 = sbr.rel (%p125_p9) target bundleno = 217 (0xd9), region = 28  ;;  %432 = vset.pattern.permute.xlu1 (!%p125_p9), %v513_v0  ;;  %431 = vset.pattern.permute.xlu0 (!%p125_p9), %v513_v0  ;;  %p155_p10 = scmp.lt.s32.totalorder (!%p125_p9), %s581_s21, 20  ;;  %v378_v10 = vld [vmem:[%s674_s1 + $0x1] ss:$0 sm:$0xff] (!%p125_p9)  ;;  %v379_v17 = vld [vmem:[%s674_s1 + $0x2] ss:$0 sm:$0xff] (!%p125_p9) }
   0xf   : > { %s374_s6 = sshll.u32 (!%p125_p9), %s147_s27, 6  ;;  %s612_s8 = scalar_lea.sflag (!%p125_p9), [#allocation3], %s147_s27 }
  0x10   : > { %s600_s7 = scalar_lea.vmem (!%p125_p9), [#allocation2], %s374_s6 }
  0x15   : > { %s156_s22 = scalar_select %p155_p10, %s581_s21, 20 }
  0x16   : > { %s297_s14 = ssub.s32 (%p570_p5), 21, %s581_s21 }
  0x17   : > { %s376_s23 = sshll.u32 %s156_s22, 3  ;;  %p298_p11 = scmp.lt.s32.totalorder (%p570_p5), %s297_s14, 8 }
  0x18   : > { %s158_s26 = scalar_lea.vmem %s673_s0, %s376_s23 }
  0x19   : > { %v171_v1 = vld [vmem:[%s158_s26 + $0x10] sm:$0xff]  ;;  %v169_v2 = vld [vmem:[%s158_s26] sm:$0xff]  ;;  %v172_v3 = vld [vmem:[%s158_s26 + $0x18] sm:$0xff] }
  0x1a   : > { %192 = vperm.xlu1 %432, %v171_v1   ;;  %182 = vperm.xlu0 %431, %v169_v2   ;;  %v170_v4 = vld [vmem:[%s158_s26 + $0x8] sm:$0xff]  ;;  %v173_v6 = vld [vmem:[%s158_s26 + $0x20] sm:$0xff]  ;;  %v176_v7 = vld [vmem:[%s158_s26 + $0x38] sm:$0xff] }
  0x1b   : > { %v174_v5 = vld [vmem:[%s158_s26 + $0x28] sm:$0xff]  ;;  %v175_v8 = vld [vmem:[%s158_s26 + $0x30] sm:$0xff] }
  0x1e   : > { %197 = vperm.xlu1 %432, %v172_v3   ;;  %187 = vperm.xlu0 %431, %v170_v4  }
  0x22   : > { %207 = vperm.xlu1 %432, %v174_v5   ;;  %202 = vperm.xlu0 %431, %v173_v6  }
  0x26   : > { %217 = vperm.xlu1 %432, %v176_v7   ;;  %212 = vperm.xlu0 %431, %v175_v8  }
  0x99   : > { %v193_v11 = vpop.permute.xlu1 %192  ;;  %v183_v12 = vpop.permute.xlu0 %182 }
  0x9a   : > { %v226_v13 = vsub.f32 %v193_v11, %v377_v9  ;;  %v224_v14 = vsub.f32 %v183_v12, %v377_v9 }
  0x9c   : > { %v238_v15 = vmul.f32 %v378_v10, %v226_v13  ;;  %v236_v16 = vmul.f32 %v378_v10, %v224_v14 }
  0x9d   : > { %v198_v18 = vpop.permute.xlu1 %197  ;;  %v188_v19 = vpop.permute.xlu0 %187 }
  0x9e   : > { %v246_v20 = vmul.f32 %v238_v15, %v238_v15  ;;  %v244_v21 = vmul.f32 %v236_v16, %v236_v16  ;;  %v227_v22 = vsub.f32 %v198_v18, %v377_v9  ;;  %v225_v23 = vsub.f32 %v188_v19, %v377_v9 }
  0xa0   : > { %v258_v24 = vsub.f32 %v379_v17, %v246_v20  ;;  %v256_v25 = vsub.f32 %v379_v17, %v244_v21  ;;  %v239_v26 = vmul.f32 %v378_v10, %v227_v22  ;;  %v237_v27 = vmul.f32 %v378_v10, %v225_v23 }
  0xa1   : > { %v208_v28 = vpop.permute.xlu1 %207  ;;  %v203_v29 = vpop.permute.xlu0 %202 }
  0xa2   : > { %v268_v30 = vmul.f32 1.442695, %v258_v24  ;;  %v264_v31 = vmul.f32 1.442695, %v256_v25  ;;  %v247_v32 = vmul.f32 %v239_v26, %v239_v26  ;;  %v245_v33 = vmul.f32 %v237_v27, %v237_v27 }
  0xa3   : > { %v229_v34 = vsub.f32 %v208_v28, %v377_v9  ;;  %v228_v35 = vsub.f32 %v203_v29, %v377_v9 }
  0xa4   : > { %433 = vpow2.f32 %v268_v30  ;;  %v259_v36 = vsub.f32 %v379_v17, %v247_v32  ;;  %v257_v37 = vsub.f32 %v379_v17, %v245_v33 }
  0xa5   : > { %435 = vpow2.f32 %v264_v31  ;;  %v241_v38 = vmul.f32 %v378_v10, %v229_v34  ;;  %v240_v39 = vmul.f32 %v378_v10, %v228_v35  ;;  %v218_v40 = vpop.permute.xlu1 %217  ;;  %v213_v41 = vpop.permute.xlu0 %212 }
  0xa6   : > { %v270_v42 = vmul.f32 1.442695, %v259_v36  ;;  %v266_v43 = vmul.f32 1.442695, %v257_v37  ;;  %v231_v44 = vsub.f32 %v218_v40, %v377_v9  ;;  %v230_v45 = vsub.f32 %v213_v41, %v377_v9 }
  0xa7   : > { %v249_v46 = vmul.f32 %v241_v38, %v241_v38  ;;  %v248_v47 = vmul.f32 %v240_v39, %v240_v39 }
  0xa8   : > { %437 = vpow2.f32 %v270_v42  ;;  %v243_v48 = vmul.f32 %v378_v10, %v231_v44  ;;  %v242_v49 = vmul.f32 %v378_v10, %v230_v45 }
  0xa9   : > { %439 = vpow2.f32 %v266_v43  ;;  %v261_v50 = vsub.f32 %v379_v17, %v249_v46  ;;  %v260_v51 = vsub.f32 %v379_v17, %v248_v47 }
  0xaa   : > { %v251_v52 = vmul.f32 %v243_v48, %v243_v48  ;;  %v250_v53 = vmul.f32 %v242_v49, %v242_v49 }
  0xab   : > { %v274_v54 = vmul.f32 1.442695, %v261_v50  ;;  %v272_v55 = vmul.f32 1.442695, %v260_v51 }
  0xac   : > { %v263_v56 = vsub.f32 %v379_v17, %v251_v52  ;;  %v262_v57 = vsub.f32 %v379_v17, %v250_v53 }
  0xad   : > { %441 = vpow2.f32 %v274_v54 }
  0xae   : > { %v434_v58 = vpop.eup %433  ;;  %443 = vpow2.f32 %v272_v55  ;;  %v278_v59 = vmul.f32 1.442695, %v263_v56  ;;  %v276_v60 = vmul.f32 1.442695, %v262_v57 }
  0xaf   : > { %v436_v61 = vpop.eup %435  ;;  %282 = vst [vmem:[%s600_s7 + $0x10] sm:$0xff] %v434_v58 }
  0xb0   : > { %280 = vst [vmem:[%s600_s7] sm:$0xff] %v436_v61  ;;  %445 = vpow2.f32 %v278_v59 }
  0xb1   : > { %447 = vpow2.f32 %v276_v60 }
  0xb2   : > { %v438_v62 = vpop.eup %437 }
  0xb3   : > { %v440_v63 = vpop.eup %439  ;;  %283 = vst [vmem:[%s600_s7 + $0x18] sm:$0xff] %v438_v62 }
  0xb4   : > { %281 = vst [vmem:[%s600_s7 + $0x8] sm:$0xff] %v440_v63 }
  0xb6   : > { %295 = sbr.rel (!%p570_p5) target bundleno = 217 (0xd9), region = 32 }
  0xb7   : > { %v442_v0 = vpop.eup %441 }
  0xb8   : > { %v444_v1 = vpop.eup %443  ;;  %285 = vst [vmem:[%s600_s7 + $0x28] sm:$0xff] %v442_v0 }
  0xb9   : > { %284 = vst [vmem:[%s600_s7 + $0x20] sm:$0xff] %v444_v1 }
  0xba   : > { %v446_v2 = vpop.eup %445 }
  0xbb   : > { %v448_v3 = vpop.eup %447  ;;  %287 = vst [vmem:[%s600_s7 + $0x38] sm:$0xff] %v446_v2 }
  0xbc   : > { %286 = vst [vmem:[%s600_s7 + $0x30] sm:$0xff] %v448_v3 }
  0xbd   : > { %s683_s14 = smov (!%p298_p11, %s297_s14), 8 }
  0xbe   : > { %s617_s16 = sshll.u32 %s683_s14, 7 }
  0xbf   : > { %s302_s17 = ssub.s32 1024, %s617_s16 }
  0xc0   : > { %303 = vsyncadd %s612_s8, %s302_s17  ;;  %p383_p12 = scmp.ne.s32.totalorder %s617_s16, 0  ;;  %s389_s22 = sshll.u32 %s553_s13, 10 }
  0xc1   : > { %s626_s24 = scalar_lea.hbm %s675_s2, %s389_s22  ;;  %s308_s21 = sshll.u32 %s600_s7, 4  ;;  %s629_s21 = int_to_ptr.vmem [resolvable:$true] %s308_s21 }
  0xc2   : > { %s449_s25 = scalar_lea.vmem %s629_s21, %s617_s16  ;;  %s514_s26 = smov [#allocation2]  }
  0xc3   : > { %p450_p13 = scmp.ne.s32.totalorder %s629_s21, %s449_s25  ;;  %s453_s27 = sshll.u32 %s514_s26, 4  ;;  %s454_s27 = int_to_ptr.vmem [resolvable:$false] %s453_s27 }
  0xc4   : > { %s455_s13 = scalar_lea.vmem %s454_s27, 2048  ;;  %p456_p2 = scmp.lt.s32.totalorder %s629_s21, %s454_s27 }
  0xc5   : > { %p451_p0 = pnand %p450_p13, %p383_p12  ;;  %p457_p3 = scmp.lt.s32.totalorder %s455_s13, %s449_s25 }
  0xc7   : > { %p452_p1 = pneg %p451_p0  ;;  %p458_p4 = por %p457_p3, %p456_p2 }
  0xc9   : > { %p459_p5 = pnand %p458_p4, %p452_p1 }
  0xcb   : > { %462 = shalt.err (!%p459_p5)
}
  0xcc   : > { %s463_s28 = scalar_lea.hbm %s626_s24, %s617_s16  ;;  %s467_s3 = scalar_lea.hbm %s675_s2, 2688 }
  0xcd   : > { %p464_p7 = scmp.ne.s32.totalorder %s626_s24, %s463_s28  ;;  %p468_p10 = scmp.lt.u32.totalorder %s626_s24, %s675_s2 }
  0xce   : > { %p469_p11 = scmp.lt.u32.totalorder %s467_s3, %s463_s28  ;;  %p471_p0 = scmp.lt.u32.totalorder %s463_s28, %s626_s24 }
  0xcf   : > { %p465_p8 = pnand %p464_p7, %p383_p12 }
  0xd0   : > { %p470_p13 = por %p469_p11, %p468_p10 }
  0xd1   : > { %p466_p9 = pneg %p465_p8 }
  0xd2   : > { %p472_p1 = por %p471_p0, %p470_p13 }
  0xd4   : > { %p473_p2 = pnand %p472_p1, %p466_p9 }
  0xd6   : > { %476 = shalt.err (!%p473_p2)
}
  0xd7   : > { %s515_s6 = smov 128   ;;  %s516_s7 = smov 8  }
  0xd8   : > { %314 = dma.vmem_to_hbm [thread:$0]  (%p383_p12), %s629_s21, %s617_s16, %s626_s24, %s612_s8, %s515_s6, %s515_s6, %s516_s7  }
  0xd9 PF: > { %p395_p3 = scmp.ge.s32.totalorder %s511_s12, 2  ;;  %s323_s14 = sand.u32 1, %s499_s9  }
  0xda   : > { %s324_s17 = scalar_lea.sflag [#allocation3], %s323_s14 }
  0xdb   : > { %p392_p4 = pnand %p395_p3, %p574_p6 }
  0xdd   : > { %494 = dma.done.wait (!%p392_p4), %s324_s17, 1024  }
  0xde   : > { %496 = vsyncadd (!%p392_p4), %s324_s17, 4294966272  ;;  %p12_p5 = scmp.ge.s32.totalorder %s557_s15, 5   ;;  %s678_s9 = smov %s503_s10 }
  0xdf   : > { %s679_s10 = smov %s507_s11  ;;  %s680_s11 = smov %s568_s18 }
  0xe0   : > { %s681_s12 = smov %s557_s15  ;;  %14 = sbr.rel (!%p12_p5) target bundleno = 3 (0x3), region = 63 }
  0xe7   :  { %329 = vsyncpa [#allocation3], 1 }
  0xe8   :  { %331 = vsyncpa [#allocation3 + $0x1], 1 }

</bundles_post_ra>
